<compile_context>
chip_gen: v7x
topology: tpu7x:2x2x1
jax: 0.10.0
libtpu: 0.0.40
codegen_flags: <defaults>
</compile_context>

<pallas_src>
import functools

import jax
import jax.numpy as jnp
from jax.experimental import pallas as pl
from jax.experimental.pallas import tpu as pltpu

_LANE = 128


def _round_up(x: int, m: int) -> int:
    return ((x + m - 1) // m) * m


def _dqn_kernel(x_ref, w1_ref, b1_ref, w2_ref, b2_ref, w3_ref, b3_ref, o_ref, *,
                action_dim: int):
    """Fused 3-layer MLP: bf16 operands on the MXU, f32 accumulation, f32 biases."""
    # In-kernel cast (free VPU work under a mem-bound roofline; review item 1).
    x = x_ref[...].astype(w1_ref.dtype)
    h1 = jnp.dot(x, w1_ref[...], preferred_element_type=jnp.float32) + b1_ref[...]
    h1 = jnp.maximum(h1, 0.0)
    h2 = jnp.dot(h1.astype(w2_ref.dtype), w2_ref[...],
                 preferred_element_type=jnp.float32) + b2_ref[...]
    h2 = jnp.maximum(h2, 0.0)
    q = jnp.dot(h2.astype(w3_ref.dtype), w3_ref[...],
                preferred_element_type=jnp.float32) + b3_ref[...]
    # Store only the real action columns -> narrow output block, ~32x less HBM
    # write traffic than a 128-lane-padded f32 tile (review item 2).
    o_ref[...] = q[:, :action_dim].astype(o_ref.dtype)


def _batch_tiling(batch: int):
    """Pick (block_b, n_steps).

    Small/medium batches: one big tile (single grid step, minimal fixed overhead).
    Large batches: ~2048-row tiles with an EVEN step count so the two v7x
    TensorCores sharing the 'parallel' axis stay balanced (review items 3 & 4).
    """
    b8 = _round_up(max(batch, 8), 8)
    if b8 <= 2048:
        return b8, 1
    n_steps = _round_up(pl.cdiv(b8, 2048), 2)          # even -> megacore balance
    block_b = _round_up(pl.cdiv(b8, n_steps), 8)
    return block_b, n_steps


def prepare_dqn_params(params):
    """One-time weight prep (hoisted out of the per-call path, review item 5).

    Pads hidden to a multiple of 128 lanes and the final-layer columns to 128 for
    a regular MXU tile (zero padding keeps the math exact: padded units stay 0
    through bias-add=0 and ReLU). Matmul operands are cast to bf16; biases stay f32.
    Returns (prepared_param_dict, action_dim).
    """
    state_dim, hidden_dim = params["w1"].shape
    action_dim = params["w3"].shape[1]
    hidden_pad = _round_up(hidden_dim, _LANE)
    action_lane = _round_up(action_dim, _LANE)

    prep = {
        "w1": jnp.pad(params["w1"], ((0, 0), (0, hidden_pad - hidden_dim))
                      ).astype(jnp.bfloat16),
        "b1": jnp.pad(params["b1"], ((0, 0), (0, hidden_pad - hidden_dim))
                      ).astype(jnp.float32),
        "w2": jnp.pad(params["w2"], ((0, hidden_pad - hidden_dim),
                                     (0, hidden_pad - hidden_dim))).astype(jnp.bfloat16),
        "b2": jnp.pad(params["b2"], ((0, 0), (0, hidden_pad - hidden_dim))
                      ).astype(jnp.float32),
        "w3": jnp.pad(params["w3"], ((0, hidden_pad - hidden_dim),
                                     (0, action_lane - action_dim))).astype(jnp.bfloat16),
        "b3": jnp.pad(params["b3"], ((0, 0), (0, action_lane - action_dim))
                      ).astype(jnp.float32),
    }
    return prep, action_dim


@functools.partial(jax.jit, static_argnames=("action_dim",))
def dqn_forward(x, prep, *, action_dim):
    """x: (B, state_dim) float32. prep: output of prepare_dqn_params."""
    B, state_dim = x.shape
    hidden_pad = prep["w1"].shape[1]
    action_lane = prep["w3"].shape[1]

    block_b, n_steps = _batch_tiling(B)
    B_pad = block_b * n_steps
    x_p = x if B_pad == B else jnp.pad(x, ((0, B_pad - B), (0, 0)))

    in_specs = [
        pl.BlockSpec((block_b, state_dim), lambda i: (i, 0)),       # x tile (batch-tiled)
        pl.BlockSpec((state_dim, hidden_pad), lambda i: (0, 0)),    # w1 (resident)
        pl.BlockSpec((1, hidden_pad), lambda i: (0, 0)),            # b1
        pl.BlockSpec((hidden_pad, hidden_pad), lambda i: (0, 0)),   # w2
        pl.BlockSpec((1, hidden_pad), lambda i: (0, 0)),            # b2
        pl.BlockSpec((hidden_pad, action_lane), lambda i: (0, 0)),  # w3
        pl.BlockSpec((1, action_lane), lambda i: (0, 0)),           # b3
    ]
    # Narrow (block_b, action_dim) output block: last dim equals the full array dim,
    # so no 128-lane padding and no post-kernel column slice.
    out_spec = pl.BlockSpec((block_b, action_dim), lambda i: (i, 0))

    # VMEM budget. x/out tiles are double-buffered; resident weights/biases counted
    # once (they never change across grid steps -- review item 6); intermediates are
    # lane-padded h1/h2/q. Generous 2x slack, floor at 32 MiB, cap at 64 MiB.
    def _lp(n):
        return _round_up(n, _LANE)
    xo_bytes = block_b * (_lp(state_dim) + _lp(action_dim)) * 4
    w_bytes = (_round_up(state_dim, 8) * hidden_pad
               + hidden_pad * hidden_pad + hidden_pad * action_lane) * 2
    b_bytes = (2 * hidden_pad + action_lane) * 4 * 8
    interm_bytes = block_b * (2 * hidden_pad + action_lane) * 4
    est = 2 * xo_bytes + (w_bytes + b_bytes) + interm_bytes
    vmem_limit_bytes = int(min(64 * 1024 * 1024, max(32 * 1024 * 1024, 2 * est)))

    q_pad = pl.pallas_call(
        functools.partial(_dqn_kernel, action_dim=action_dim),
        out_shape=jax.ShapeDtypeStruct((B_pad, action_dim), jnp.float32),
        grid_spec=pl.GridSpec(
            grid=(n_steps,),
            in_specs=in_specs,
            out_specs=out_spec,
        ),
        compiler_params=pltpu.CompilerParams(
            dimension_semantics=("parallel",),
            vmem_limit_bytes=vmem_limit_bytes,
        ),
    )(x_p, prep["w1"], prep["b1"], prep["w2"], prep["b2"], prep["w3"], prep["b3"])

    return q_pad if B_pad == B else q_pad[:B]


def init_dqn_params(key, state_dim, action_dim, hidden_dim=64, dtype=jnp.float32):
    """PyTorch-style init U(-1/sqrt(fan_in), 1/sqrt(fan_in)); weights stored (in, out)."""
    keys = jax.random.split(key, 6)

    def linear(kw, kb, fan_in, fan_out):
        bound = 1.0 / jnp.sqrt(jnp.array(fan_in, dtype))
        w = jax.random.uniform(kw, (fan_in, fan_out), dtype, -bound, bound)
        b = jax.random.uniform(kb, (1, fan_out), dtype, -bound, bound)
        return w, b

    w1, b1 = linear(keys[0], keys[1], state_dim, hidden_dim)
    w2, b2 = linear(keys[2], keys[3], hidden_dim, hidden_dim)
    w3, b3 = linear(keys[4], keys[5], hidden_dim, action_dim)
    return {"w1": w1, "b1": b1, "w2": w2, "b2": b2, "w3": w3, "b3": b3}


def dqn_reference_f32(x, p):
    """Pure-JAX f32 reference matching nn.Sequential(Linear, ReLU, Linear, ReLU, Linear)."""
    h1 = jnp.maximum(x @ p["w1"] + p["b1"], 0.0)
    h2 = jnp.maximum(h1 @ p["w2"] + p["b2"], 0.0)
    return h2 @ p["w3"] + p["b3"]


def dqn_reference_bf16(x, p):
    """Reference with the same bf16-operand / f32-accumulate recipe as the kernel."""
    xb = x.astype(jnp.bfloat16)
    h1 = jnp.maximum(
        jnp.dot(xb, p["w1"].astype(jnp.bfloat16), preferred_element_type=jnp.float32)
        + p["b1"], 0.0)
    h2 = jnp.maximum(
        jnp.dot(h1.astype(jnp.bfloat16), p["w2"].astype(jnp.bfloat16),
                preferred_element_type=jnp.float32) + p["b2"], 0.0)
    return (jnp.dot(h2.astype(jnp.bfloat16), p["w3"].astype(jnp.bfloat16),
                    preferred_element_type=jnp.float32) + p["b3"])


if __name__ == "__main__":
    key = jax.random.PRNGKey(0)
    k_param, k_x1, k_x2 = jax.random.split(key, 3)

    state_dim, action_dim, hidden_dim = 16, 4, 64
    params = init_dqn_params(k_param, state_dim, action_dim, hidden_dim)
    prep, a_dim = prepare_dqn_params(params)   # one-time weight prep (hoisted)

    # --- small batch: typical action-selection path (single grid step) ---
    x_small = jax.random.normal(k_x1, (8, state_dim), dtype=jnp.float32)
    q_small = jax.block_until_ready(dqn_forward(x_small, prep, action_dim=a_dim))
    assert q_small.shape == (8, action_dim)
    assert jnp.allclose(q_small, dqn_reference_bf16(x_small, params),
                        atol=2e-3, rtol=2e-3), "small-batch mismatch vs bf16 reference"
    assert jnp.allclose(q_small, dqn_reference_f32(x_small, params),
                        atol=5e-2, rtol=5e-2), "small-batch mismatch vs f32 reference"

    # --- larger batch: exercises batch padding + even multi-step grid ---
    x_big = jax.random.normal(k_x2, (2600, state_dim), dtype=jnp.float32)
    q_big = jax.block_until_ready(dqn_forward(x_big, prep, action_dim=a_dim))
    assert q_big.shape == (2600, action_dim)
    assert jnp.allclose(q_big, dqn_reference_bf16(x_big, params),
                        atol=2e-3, rtol=2e-3), "large-batch mismatch vs bf16 reference"
    assert jnp.allclose(q_big, dqn_reference_f32(x_big, params),
                        atol=5e-2, rtol=5e-2), "large-batch mismatch vs f32 reference"

    print("KERNEL_OK")
</pallas_src>

<mosaic_0001>
module attributes {stable_mosaic.version = 11 : i64} {
  func.func @_dqn_kernel(%arg0: i32, %arg1: memref<8x16xf32, #tpu.memory_space<vmem>>, %arg2: memref<16x128xbf16, #tpu.memory_space<vmem>>, %arg3: memref<1x128xf32, #tpu.memory_space<vmem>>, %arg4: memref<128x128xbf16, #tpu.memory_space<vmem>>, %arg5: memref<1x128xf32, #tpu.memory_space<vmem>>, %arg6: memref<128x128xbf16, #tpu.memory_space<vmem>>, %arg7: memref<1x128xf32, #tpu.memory_space<vmem>>, %arg8: memref<8x4xf32, #tpu.memory_space<vmem>>) attributes {dimension_semantics = [#tpu.dimension_semantics<parallel>], iteration_bounds = array<i64: 1>, scalar_prefetch = 0 : i64, scratch_operands = 0 : i64, tpu.core_type = #tpu.core_type<tc>, window_params = [{transform_indices = @transform_0, window_bounds = array<i64: 8, 16>}, {pipeline_mode = #tpu.pipeline_mode<synchronous>, transform_indices = @transform_1, window_bounds = array<i64: 16, 128>}, {pipeline_mode = #tpu.pipeline_mode<synchronous>, transform_indices = @transform_2, window_bounds = array<i64: 1, 128>}, {pipeline_mode = #tpu.pipeline_mode<synchronous>, transform_indices = @transform_3, window_bounds = array<i64: 128, 128>}, {pipeline_mode = #tpu.pipeline_mode<synchronous>, transform_indices = @transform_4, window_bounds = array<i64: 1, 128>}, {pipeline_mode = #tpu.pipeline_mode<synchronous>, transform_indices = @transform_5, window_bounds = array<i64: 128, 128>}, {pipeline_mode = #tpu.pipeline_mode<synchronous>, transform_indices = @transform_6, window_bounds = array<i64: 1, 128>}, {transform_indices = @transform_7, window_bounds = array<i64: 8, 4>}]} {
    %c0 = arith.constant 0 : index
    %c0_0 = arith.constant 0 : index
    %0 = vector.load %arg1[%c0, %c0_0] : memref<8x16xf32, #tpu.memory_space<vmem>>, vector<8x16xf32>
    %1 = arith.truncf %0 : vector<8x16xf32> to vector<8x16xbf16>
    %c0_1 = arith.constant 0 : index
    %c0_2 = arith.constant 0 : index
    %2 = vector.load %arg2[%c0_1, %c0_2] : memref<16x128xbf16, #tpu.memory_space<vmem>>, vector<16x128xbf16>
    %cst = arith.constant dense<0.000000e+00> : vector<8x128xf32>
    %3 = tpu.matmul %1, %2, %cst {dimension_numbers = #tpu.dot_dimension_numbers<[1], [0], [0], [1], [0, 0, 1, 1], [], []>} : vector<8x16xbf16>, vector<16x128xbf16>, vector<8x128xf32> -> vector<8x128xf32>
    %c0_3 = arith.constant 0 : index
    %c0_4 = arith.constant 0 : index
    %4 = vector.load %arg3[%c0_3, %c0_4] : memref<1x128xf32, #tpu.memory_space<vmem>>, vector<1x128xf32>
    %5 = vector.broadcast %4 : vector<1x128xf32> to vector<8x128xf32>
    %6 = arith.addf %3, %5 : vector<8x128xf32>
    %cst_5 = arith.constant 0.000000e+00 : f32
    %7 = vector.broadcast %cst_5 : f32 to vector<8x128xf32>
    %8 = arith.maximumf %6, %7 : vector<8x128xf32>
    %9 = arith.truncf %8 : vector<8x128xf32> to vector<8x128xbf16>
    %c0_6 = arith.constant 0 : index
    %c0_7 = arith.constant 0 : index
    %10 = vector.load %arg4[%c0_6, %c0_7] : memref<128x128xbf16, #tpu.memory_space<vmem>>, vector<128x128xbf16>
    %cst_8 = arith.constant dense<0.000000e+00> : vector<8x128xf32>
    %11 = tpu.matmul %9, %10, %cst_8 {dimension_numbers = #tpu.dot_dimension_numbers<[1], [0], [0], [1], [0, 0, 1, 1], [], []>} : vector<8x128xbf16>, vector<128x128xbf16>, vector<8x128xf32> -> vector<8x128xf32>
    %c0_9 = arith.constant 0 : index
    %c0_10 = arith.constant 0 : index
    %12 = vector.load %arg5[%c0_9, %c0_10] : memref<1x128xf32, #tpu.memory_space<vmem>>, vector<1x128xf32>
    %13 = vector.broadcast %12 : vector<1x128xf32> to vector<8x128xf32>
    %14 = arith.addf %11, %13 : vector<8x128xf32>
    %cst_11 = arith.constant 0.000000e+00 : f32
    %15 = vector.broadcast %cst_11 : f32 to vector<8x128xf32>
    %16 = arith.maximumf %14, %15 : vector<8x128xf32>
    %17 = arith.truncf %16 : vector<8x128xf32> to vector<8x128xbf16>
    %c0_12 = arith.constant 0 : index
    %c0_13 = arith.constant 0 : index
    %18 = vector.load %arg6[%c0_12, %c0_13] : memref<128x128xbf16, #tpu.memory_space<vmem>>, vector<128x128xbf16>
    %cst_14 = arith.constant dense<0.000000e+00> : vector<8x128xf32>
    %19 = tpu.matmul %17, %18, %cst_14 {dimension_numbers = #tpu.dot_dimension_numbers<[1], [0], [0], [1], [0, 0, 1, 1], [], []>} : vector<8x128xbf16>, vector<128x128xbf16>, vector<8x128xf32> -> vector<8x128xf32>
    %c0_15 = arith.constant 0 : index
    %c0_16 = arith.constant 0 : index
    %20 = vector.load %arg7[%c0_15, %c0_16] : memref<1x128xf32, #tpu.memory_space<vmem>>, vector<1x128xf32>
    %21 = vector.broadcast %20 : vector<1x128xf32> to vector<8x128xf32>
    %22 = arith.addf %19, %21 : vector<8x128xf32>
    %23 = vector.extract_strided_slice %22 {offsets = [0, 0], sizes = [8, 4], strides = [1, 1]} : vector<8x128xf32> to vector<8x4xf32>
    %c0_17 = arith.constant 0 : index
    %c0_18 = arith.constant 0 : index
    %24 = vector.load %arg8[%c0_17, %c0_18] : memref<8x4xf32, #tpu.memory_space<vmem>>, vector<8x4xf32>
    tpu.vector_store %arg8[%c0_17, %c0_18], %23 {strides = array<i32>} : memref<8x4xf32, #tpu.memory_space<vmem>>, vector<8x4xf32>,
    return
  }
  func.func @transform_0(%arg0: i32) -> (i32, i32) {
    %c0_i32 = arith.constant 0 : i32
    %c0_i32_0 = arith.constant 0 : i32
    return %arg0, %c0_i32 : i32, i32
  }
  func.func @transform_1(%arg0: i32) -> (i32, i32) {
    %c0_i32 = arith.constant 0 : i32
    %c0_i32_0 = arith.constant 0 : i32
    %c0_i32_1 = arith.constant 0 : i32
    return %c0_i32, %c0_i32_0 : i32, i32
  }
  func.func @transform_2(%arg0: i32) -> (i32, i32) {
    %c0_i32 = arith.constant 0 : i32
    %c0_i32_0 = arith.constant 0 : i32
    %c0_i32_1 = arith.constant 0 : i32
    return %c0_i32, %c0_i32_0 : i32, i32
  }
  func.func @transform_3(%arg0: i32) -> (i32, i32) {
    %c0_i32 = arith.constant 0 : i32
    %c0_i32_0 = arith.constant 0 : i32
    %c0_i32_1 = arith.constant 0 : i32
    return %c0_i32, %c0_i32_0 : i32, i32
  }
  func.func @transform_4(%arg0: i32) -> (i32, i32) {
    %c0_i32 = arith.constant 0 : i32
    %c0_i32_0 = arith.constant 0 : i32
    %c0_i32_1 = arith.constant 0 : i32
    return %c0_i32, %c0_i32_0 : i32, i32
  }
  func.func @transform_5(%arg0: i32) -> (i32, i32) {
    %c0_i32 = arith.constant 0 : i32
    %c0_i32_0 = arith.constant 0 : i32
    %c0_i32_1 = arith.constant 0 : i32
    return %c0_i32, %c0_i32_0 : i32, i32
  }
  func.func @transform_6(%arg0: i32) -> (i32, i32) {
    %c0_i32 = arith.constant 0 : i32
    %c0_i32_0 = arith.constant 0 : i32
    %c0_i32_1 = arith.constant 0 : i32
    return %c0_i32, %c0_i32_0 : i32, i32
  }
  func.func @transform_7(%arg0: i32) -> (i32, i32) {
    %c0_i32 = arith.constant 0 : i32
    %c0_i32_0 = arith.constant 0 : i32
    return %arg0, %c0_i32 : i32, i32
  }
}

</mosaic_0001>

<bundles_post_ra>
// kernel: dqn_forward.1
= control target key start
LH: loop header
LB: loop body
LE: loop exit
PB: predicated region body
PF: predicated region fallthrough
CT: control target
= control target key end

     0   :  { %12 = vsyncpa [#allocation3], 0  ;;  %s666_s0 = inlined_call_operand.hbm [shape: f32[8,16], index: 0, kind: input, shape index: {}]   ;;  %s667_s1 = inlined_call_operand.vmem [shape: bf16[16,128], index: 1, kind: input, shape index: {}]   ;;  %s668_s2 = inlined_call_operand.vmem [shape: f32[1,128], index: 2, kind: input, shape index: {}]   ;;  %s669_s3 = inlined_call_operand.hbm [shape: bf16[128,128], index: 3, kind: input, shape index: {}]   ;;  %s670_s4 = inlined_call_operand.vmem [shape: f32[1,128], index: 4, kind: input, shape index: {}]   ;;  %s671_s5 = inlined_call_operand.hbm [shape: bf16[128,128], index: 5, kind: input, shape index: {}]   ;;  %s672_s6 = inlined_call_operand.vmem [shape: f32[1,128], index: 6, kind: input, shape index: {}]   ;;  %s673_s7 = inlined_call_operand.vmem [shape: f32[8,4], index: 7, kind: output, shape index: {}]  }
   0x1   :  { %13 = vsyncpa [#allocation5], 0  ;;  %s542_s24 = smov [#allocation4]   ;;  %s472_s28 = scalar_lea.hbm %s669_s3, 1024 }
   0x2   :  { %s33_s25 = sshll.u32 %s542_s24, 4  ;;  %p473_p0 = scmp.ne.s32.totalorder %s669_s3, %s472_s28  ;;  %s34_s25 = int_to_ptr.vmem [resolvable:$true] %s33_s25 }
   0x3   :  { %p476_p1 = scmp.lt.u32.totalorder %s472_s28, %s669_s3 }
   0x5   :  { %p478_p2 = pnand %p476_p1, %p473_p0 }
   0x7   :  { %481 = shalt.err (!%p478_p2)
}
   0x8   :  { %s482_s10 = scalar_lea.vmem %s34_s25, 1024  ;;  %p487_p4 = scmp.lt.s32.totalorder %s34_s25, %s34_s25 }
   0x9   :  { %p483_p3 = scmp.ne.s32.totalorder %s34_s25, %s482_s10  ;;  %p488_p5 = scmp.lt.s32.totalorder %s482_s10, %s482_s10 }
   0xb   :  { %p489_p6 = por %p488_p5, %p487_p4 }
   0xd   :  { %p490_p7 = pnand %p489_p6, %p483_p3 }
   0xf   :  { %493 = shalt.err (!%p490_p7)
}
  0x10   :  { %s543_s11 = smov 64   ;;  %s544_s12 = smov 4  }
  0x11   :  { %39 = dma.hbm_to_vmem [thread:$0]  %s669_s3, 1024, %s34_s25, [#allocation5], %s543_s11, %s543_s11, %s544_s12  }
  0x12   :  { %s545_s15 = smov [#allocation2]   ;;  %s546_s17 = smov [#allocation6]  }
  0x13   :  { %s20_s16 = sshll.u32 %s545_s15, 4  ;;  %s47_s18 = sshll.u32 %s546_s17, 4  ;;  %s21_s16 = int_to_ptr.vmem [resolvable:$true] %s20_s16  ;;  %s48_s18 = int_to_ptr.vmem [resolvable:$true] %s47_s18 }
  0x14   :  { %s494_s21 = scalar_lea.hbm %s666_s0, 128 }
  0x15   :  { %p495_p8 = scmp.ne.s32.totalorder %s666_s0, %s494_s21  ;;  %p498_p9 = scmp.lt.u32.totalorder %s494_s21, %s666_s0 }
  0x17   :  { %p500_p10 = pnand %p498_p9, %p495_p8 }
  0x19   :  { %503 = shalt.err (!%p500_p10)
}
  0x1a   :  { %s504_s3 = scalar_lea.vmem %s21_s16, 128  ;;  %p509_p12 = scmp.lt.s32.totalorder %s21_s16, %s21_s16 }
  0x1b   :  { %p505_p11 = scmp.ne.s32.totalorder %s21_s16, %s504_s3  ;;  %p510_p13 = scmp.lt.s32.totalorder %s504_s3, %s504_s3 }
  0x1d   :  { %p511_p0 = por %p510_p13, %p509_p12 }
  0x1f   :  { %p512_p1 = pnand %p511_p0, %p505_p11 }
  0x21   :  { %515 = shalt.err (!%p512_p1)
}
  0x22   :  { %23 = dma.hbm_to_vmem [thread:$0]  %s666_s0, 128, %s21_s16, [#allocation3]  }
  0x23   :  { %s516_s30 = scalar_lea.hbm %s671_s5, 1024 }
  0x24   :  { %p517_p2 = scmp.ne.s32.totalorder %s671_s5, %s516_s30  ;;  %p520_p3 = scmp.lt.u32.totalorder %s516_s30, %s671_s5 }
  0x26   :  { %p522_p4 = pnand %p520_p3, %p517_p2 }
  0x28   :  { %525 = shalt.err (!%p522_p4)
}
  0x29   :  { %s526_s14 = scalar_lea.vmem %s48_s18, 1024  ;;  %p531_p6 = scmp.lt.s32.totalorder %s48_s18, %s48_s18 }
  0x2a   :  { %p527_p5 = scmp.ne.s32.totalorder %s48_s18, %s526_s14  ;;  %p532_p7 = scmp.lt.s32.totalorder %s526_s14, %s526_s14 }
  0x2c   :  { %p533_p8 = por %p532_p7, %p531_p6 }
  0x2e   :  { %p534_p9 = pnand %p533_p8, %p527_p5 }
  0x30   :  { %537 = shalt.err (!%p534_p9)
}
  0x31   :  { %53 = dma.hbm_to_vmem [thread:$0]  %s671_s5, 1024, %s48_s18, [#allocation5], %s543_s11, %s543_s11, %s544_s12  }
  0x32   :  { %538 = dma.done.wait [#allocation3], 128  }
  0x33   :  { %539 = vsyncadd [#allocation3], 4294967168 }
  0x34   :  { %540 = dma.done.wait [#allocation5], 2048  }
  0x35   :  { %541 = vsyncadd [#allocation5], 4294965248  ;;  %v547_v0 = vmov 0.0   ;;  %vm548_vm0 = vmmov 0   ;;  %v455_v1 = vld [vmem:[%s667_s1] sm:$0xff]   ;;  %vm83_vm1 = vcmask 130048  }
  0x36   :  { %402 = vmatprep.subr.bf16.mxu0 %v547_v0  ;;  %404 = vmatprep.mubr.msk.bf16.mxu0 %vm548_vm0, %v547_v0  ;;  %v66_v2 = vld [vmem:[#allocation2] sm:$0xff]  ;;  %v456_v4 = vld [vmem:[#allocation4] sm:$0xff]   ;;  %v457_v5 = vld [vmem:[#allocation4 + $0x8] sm:$0xff]   ;;  %vm353_vm2 = vcmask 31744  }
  0x37   :  { %408 = vmatprep.subr.bf16.mxu1 %v547_v0  ;;  %424 = vmatprep.mubr.msk.bf16.mxu1 %vm548_vm0, %v547_v0  ;;  %v67_v3 = vpack.c.bf16 %v66_v2, %v66_v2  ;;  %v458_v6 = vld [vmem:[#allocation4 + $0x10] sm:$0xff]   ;;  %v459_v7 = vld [vmem:[#allocation4 + $0x18] sm:$0xff]   ;;  %v460_v8 = vld [vmem:[#allocation4 + $0x20] sm:$0xff]  }
  0x38   :  { %403 = vmatpush3.bf16.msra.mxu0 %v455_v1  ;;  %409 = vmatpush3.bf16.msra.mxu1 %v456_v4  ;;  %v461_v9 = vld [vmem:[#allocation4 + $0x28] sm:$0xff]   ;;  %v462_v10 = vld [vmem:[#allocation4 + $0x30] sm:$0xff]   ;;  %v463_v11 = vld [vmem:[#allocation4 + $0x38] sm:$0xff]  }
  0x39   :  { %428 = vmatprep.subr.bf16.mxu0 %v547_v0  ;;  %410 = vmatprep.subr.bf16.mxu1 %v547_v0  ;;  %v464_v12 = vld [vmem:[#allocation6] sm:$0xff]   ;;  %v465_v13 = vld [vmem:[#allocation6 + $0x8] sm:$0xff]   ;;  %v466_v14 = vld [vmem:[#allocation6 + $0x10] sm:$0xff]  }
  0x3a   :  { %v467_v15 = vld [vmem:[#allocation6 + $0x18] sm:$0xff]   ;;  %v468_v16 = vld [vmem:[#allocation6 + $0x20] sm:$0xff]   ;;  %v469_v17 = vld [vmem:[#allocation6 + $0x28] sm:$0xff]  }
  0x3b   :  { %405 = vmatmul.mubr.msk.bf16.vlgmr.msra.gmra.mrb[0].mxu0 %vm83_vm1, %v67_v3  ;;  %v361_v18 = vld [vmem:[%s668_s2] ss:$0 sm:$0xff]  ;;  %v470_v26 = vld [vmem:[#allocation6 + $0x30] sm:$0xff]  }
  0x3c   :  { %444 = vmatprep.mubr.msk.bf16.mxu0 %vm548_vm0, %v547_v0  ;;  %411 = vmatpush3.bf16.msra.mxu1 %v457_v5  ;;  %v471_v27 = vld [vmem:[#allocation6 + $0x38] sm:$0xff]  }
  0x3d   :  { %412 = vmatprep.subr.bf16.mxu1 %v547_v0  ;;  %429 = vmatpush3.bf16.msra.mxu0 %v464_v12  ;;  %v364_v28 = vld [vmem:[%s670_s4] ss:$0 sm:$0xff] }
  0x3e   :  { %430 = vmatprep.subr.bf16.mxu0 %v547_v0  ;;  %v373_v36 = vld [vmem:[%s672_s6] ss:$0 sm:$0xff] }
  0x40   :  { %413 = vmatpush3.bf16.msra.mxu1 %v458_v6 }
  0x41   :  { %414 = vmatprep.subr.bf16.mxu1 %v547_v0  ;;  %431 = vmatpush3.bf16.msra.mxu0 %v465_v13 }
  0x42   :  { %432 = vmatprep.subr.bf16.mxu0 %v547_v0 }
  0x44   :  { %415 = vmatpush3.bf16.msra.mxu1 %v459_v7 }
  0x45   :  { %416 = vmatprep.subr.bf16.mxu1 %v547_v0  ;;  %433 = vmatpush3.bf16.msra.mxu0 %v466_v14 }
  0x46   :  { %434 = vmatprep.subr.bf16.mxu0 %v547_v0 }
  0x48   :  { %417 = vmatpush3.bf16.msra.mxu1 %v460_v8 }
  0x49   :  { %418 = vmatprep.subr.bf16.mxu1 %v547_v0  ;;  %435 = vmatpush3.bf16.msra.mxu0 %v467_v15 }
  0x4a   :  { %436 = vmatprep.subr.bf16.mxu0 %v547_v0 }
  0x4c   :  { %419 = vmatpush3.bf16.msra.mxu1 %v461_v9 }
  0x4d   :  { %420 = vmatprep.subr.bf16.mxu1 %v547_v0  ;;  %437 = vmatpush3.bf16.msra.mxu0 %v468_v16 }
  0x4e   :  { %438 = vmatprep.subr.bf16.mxu0 %v547_v0 }
  0x50   :  { %421 = vmatpush3.bf16.msra.mxu1 %v462_v10 }
  0x51   :  { %422 = vmatprep.subr.bf16.mxu1 %v547_v0  ;;  %439 = vmatpush3.bf16.msra.mxu0 %v469_v17 }
  0x52   :  { %440 = vmatprep.subr.bf16.mxu0 %v547_v0 }
  0x54   :  { %423 = vmatpush3.bf16.msra.mxu1 %v463_v11 }
  0x55   :  { %441 = vmatpush3.bf16.msra.mxu0 %v470_v26 }
  0x56   :  { %442 = vmatprep.subr.bf16.mxu0 %v547_v0 }
  0x59   :  { %443 = vmatpush3.bf16.msra.mxu0 %v471_v27 }
 0x10e   :  { %v121_v19 = vpop.f32.mrb[0].mxu0 }
 0x10f   :  { %v122_v20 = vadd.f32 %v361_v18, %v121_v19  ;;  %v406_v21 = vpop.f32.mrb[1].mxu0 }
 0x110   :  { %v124_v22 = vpop.f32.mrb[2].mxu0 }
 0x111   :  { %v127_v23 = vmax.f32 %v122_v20, 0.0  ;;  %v407_v24 = vpop.f32.mrb[3].mxu0 }
 0x113   :  { %v128_v25 = vpack.c.bf16 %v127_v23, %v127_v23 }
 0x115   :  { %425 = vmatmul.mubr.bf16.vlgmr.msra.gmra.mrb[0].mxu1 %v128_v25 }
 0x1e8   :  { %v234_v29 = vpop.f32.mrb[0].mxu1 }
 0x1e9   :  { %v235_v30 = vadd.f32 %v364_v28, %v234_v29  ;;  %v426_v31 = vpop.f32.mrb[1].mxu1 }
 0x1ea   :  { %v237_v32 = vpop.f32.mrb[2].mxu1 }
 0x1eb   :  { %v240_v33 = vmax.f32 %v235_v30, 0.0  ;;  %v427_v34 = vpop.f32.mrb[3].mxu1 }
 0x1ed   :  { %v241_v35 = vpack.c.bf16 %v240_v33, %v240_v33 }
 0x1ef   :  { %445 = vmatmul.mubr.bf16.vlgmr.msra.gmra.mrb[4].mxu0 %v241_v35 }
 0x2c2   :  { %v347_v37 = vpop.f32.mrb[4].mxu0 }
 0x2c3   :  { %v348_v38 = vadd.f32 %v373_v36, %v347_v37  ;;  %v446_v39 = vpop.f32.mrb[5].mxu0 }
 0x2c4   :  { %v350_v40 = vpop.f32.mrb[6].mxu0 }
 0x2c5   :  { %354 = vst.msk [vmem:[%s673_s7] sm:$0xff] %vm353_vm2, %v348_v38  ;;  %v447_v41 = vpop.f32.mrb[7].mxu0 }
 0x2c6   :  { %359 = vsyncpa [#allocation3], 1 }
 0x2c7   :  { %360 = vsyncpa [#allocation5], 1 }

</bundles_post_ra>
